<compile_context>
chip_gen: v7x
topology: tpu7x:2x2x1
jax: 0.10.0
libtpu: 0.0.40
codegen_flags: <defaults>
</compile_context>

<pallas_src>
import functools

import jax
import jax.numpy as jnp
from jax import lax
from jax.experimental import pallas as pl
from jax.experimental.pallas import tpu as pltpu


_ROW_ALIGN = 16  # bf16 sublane packing: keep row tiles multiples of 16.


def _gelu_new(x):
    # "gelu_new" (tanh approximation), matching HuggingFace ACT2FN["gelu_new"],
    # T5's default dense_act_fn for gated variants.
    c = jnp.sqrt(2.0 / jnp.pi).astype(x.dtype)
    return 0.5 * x * (1.0 + jnp.tanh(c * (x + 0.044715 * x * x * x)))


def _round_up(x, m):
    return (x + m - 1) // m * m


def _cdiv(a, b):
    return (a + b - 1) // b


_VMEM_CAP_CACHE = None


def _vmem_capacity_bytes():
    """Physical VMEM of the current generation (fallback: 64 MiB = v7x)."""
    global _VMEM_CAP_CACHE
    if _VMEM_CAP_CACHE is None:
        cap = None
        try:
            cap = getattr(pltpu.get_tpu_info(), "vmem_capacity_bytes", None)
        except Exception:
            cap = None
        _VMEM_CAP_CACHE = int(cap) if cap else 64 * 1024 * 1024
    return _VMEM_CAP_CACHE


def _pick_chunk(tf):
    """Largest of 512/256/128 that divides tf (bounds the live f32 temps)."""
    for c in (512, 256, 128):
        if tf % c == 0:
            return c
    return tf


def _vmem_estimate(tm, tf, chunk, d_model, itemsize, out_itemsize):
    """Rough VMEM footprint (bytes) of one pipelined grid step."""
    x_tile = tm * d_model * itemsize * 2           # double-buffered input rows
    w_in = 2 * d_model * tf * itemsize * 2         # wi0 + wi1 tiles (dbl-buf)
    w_out = tf * d_model * itemsize * 2            # wo tile (dbl-buf)
    out_tile = tm * d_model * out_itemsize * 2     # output tile (dbl-buf)
    acc = tm * d_model * 4                         # f32 accumulator scratch
    interm = 3 * tm * chunk * 4 + tm * d_model * 4  # gate/lin/h chunk + partial
    return x_tile + w_in + w_out + out_tile + acc + interm


def _tf_candidates(d_ff):
    """Preference order: full d_ff (resident weights), then <=1024 divisors."""
    if d_ff % 128 != 0:
        return [d_ff]  # rely on the "full dim" BlockSpec rule
    cands = [d_ff]
    t = min(d_ff, 1024) // 128 * 128
    while t >= 128:
        if d_ff % t == 0 and t != d_ff:
            cands.append(t)
        t -= 128
    return cands


def _pick_tiles(M, d_model, d_ff, tm_req, tf_req, itemsize, out_itemsize, budget):
    """Pick (tm, tf).  VMEM is spent on tm first (weight-stream intensity ~ tm);
    tf only affects VMEM, not total weight bytes streamed, so it shrinks first."""
    tm = _round_up(min(tm_req, _round_up(M, _ROW_ALIGN)), _ROW_ALIGN)
    tfs = [tf_req] if tf_req is not None else _tf_candidates(d_ff)
    while True:
        for tf_c in tfs:
            chunk = _pick_chunk(tf_c)
            if _vmem_estimate(tm, tf_c, chunk, d_model,
                              itemsize, out_itemsize) <= budget:
                return tm, tf_c
        if tm <= 64:
            # Pathological shapes (huge d_model): take the smallest tiles and
            # rely on the vmem_limit clamp; compiler may spill but stays safe.
            return tm, tfs[-1]
        tm = max(64, _round_up(tm // 2, _ROW_ALIGN))


def prepare_weights(wi0_t, wi1_t, wo_t, compute_dtype=jnp.bfloat16):
    """Cast weights once at parameter-load time (call OUTSIDE any per-step jit)."""
    return (wi0_t.astype(compute_dtype),
            wi1_t.astype(compute_dtype),
            wo_t.astype(compute_dtype))


def _make_ffn_kernel(chunk, n_chunks):
    """Grid = (row tiles, d_ff tiles); axis 1 is the d_ff reduction, accumulated
    in an f32 VMEM scratch and written out on the last j step.  Inside each
    step the d_ff tile is processed in `chunk`-wide slices so the gate/linear
    f32 intermediates stay small."""

    def kernel(x_ref, wi0_ref, wi1_ref, wo_ref, o_ref, acc_ref):
        j = pl.program_id(1)
        x = x_ref[...]                                   # (tm, d_model)

        def partial_out(off):
            g = jnp.dot(x, wi0_ref[:, pl.ds(off, chunk)],
                        preferred_element_type=jnp.float32)   # (tm, chunk) f32
            l = jnp.dot(x, wi1_ref[:, pl.ds(off, chunk)],
                        preferred_element_type=jnp.float32)
            h = (_gelu_new(g) * l).astype(wo_ref.dtype)        # gating in f32
            # dropout: identity (eval mode)
            return jnp.dot(h, wo_ref[pl.ds(off, chunk), :],
                           preferred_element_type=jnp.float32)  # (tm, d_model)

        first = partial_out(0)

        @pl.when(j == 0)
        def _():
            acc_ref[...] = first          # direct write: no zero-init + RMW

        @pl.when(j > 0)
        def _():
            acc_ref[...] += first

        if n_chunks > 1:
            def body(c, carry):
                off = pl.multiple_of(c * chunk, chunk)
                acc_ref[...] += partial_out(off)
                return carry
            lax.fori_loop(1, n_chunks, body, 0, unroll=True)

        @pl.when(j == pl.num_programs(1) - 1)
        def _():
            o_ref[...] = acc_ref[...].astype(o_ref.dtype)

    return kernel


@functools.partial(jax.jit, static_argnames=("tm", "tf", "compute_dtype"))
def t5_dense_gated_act_dense(hidden_states, wi0_t, wi1_t, wo_t, *,
                             tm=512, tf=None, compute_dtype=jnp.bfloat16):
    B, S, d_model = hidden_states.shape
    d_ff = wi0_t.shape[1]
    assert wi1_t.shape == (d_model, d_ff) and wo_t.shape == (d_ff, d_model)
    if tf is not None:
        assert d_ff % tf == 0, "tf must divide d_ff"

    out_dtype = hidden_states.dtype
    if compute_dtype is None:
        compute_dtype = hidden_states.dtype
    itemsize = jnp.dtype(compute_dtype).itemsize
    out_itemsize = jnp.dtype(out_dtype).itemsize

    # --- generation-aware VMEM budget (v7x: 64 MiB, v5e/v6e: 128 MiB) ---
    cap = _vmem_capacity_bytes()
    budget = (cap * 3) // 4

    # --- tile selection ---
    M = B * S
    tm_p, tf_p = _pick_tiles(M, d_model, d_ff, tm, tf,
                             itemsize, out_itemsize, budget)
    nj = d_ff // tf_p
    chunk = _pick_chunk(tf_p)
    n_chunks = tf_p // chunk

    # --- row tiling: minimize padding; >=2 tiles for v7x megacore when the
    #     weights are fully resident (splitting rows is then free) ---
    n_rows = _cdiv(M, tm_p)
    if n_rows == 1 and nj == 1 and M >= 2 * _ROW_ALIGN:
        n_rows = 2
    tm_p = min(tm_p, _round_up(_cdiv(M, n_rows), _ROW_ALIGN))
    M_pad = n_rows * tm_p

    # --- activations / weights in compute dtype (weights: no-op if pre-cast
    #     via prepare_weights at load time) ---
    x2d = hidden_states.reshape(M, d_model).astype(compute_dtype)
    if M_pad != M:
        x2d = jnp.pad(x2d, ((0, M_pad - M), (0, 0)))
    wi0c = wi0_t.astype(compute_dtype)
    wi1c = wi1_t.astype(compute_dtype)
    woc = wo_t.astype(compute_dtype)

    est = _vmem_estimate(tm_p, tf_p, chunk, d_model, itemsize, out_itemsize)
    vmem_limit = int(min(max(est * 1.4 + (4 << 20), 32 << 20), cap - (8 << 20)))
    vmem_limit = max(vmem_limit, 16 << 20)

    weight_bytes = 3 * d_model * d_ff * itemsize
    weight_streams = 1 if nj == 1 else n_rows
    cost = pl.CostEstimate(
        flops=int(6 * M_pad * d_model * d_ff),
        transcendentals=int(M_pad * d_ff),
        bytes_accessed=int(M_pad * d_model * (itemsize + out_itemsize)
                           + weight_bytes * weight_streams),
    )

    out2d = pl.pallas_call(
        _make_ffn_kernel(chunk, n_chunks),
        out_shape=jax.ShapeDtypeStruct((M_pad, d_model), out_dtype),
        grid_spec=pltpu.PrefetchScalarGridSpec(
            num_scalar_prefetch=0,
            grid=(n_rows, nj),
            in_specs=[
                pl.BlockSpec((tm_p, d_model), lambda i, j: (i, 0)),   # x rows
                pl.BlockSpec((d_model, tf_p), lambda i, j: (0, j)),   # wi_0 tile
                pl.BlockSpec((d_model, tf_p), lambda i, j: (0, j)),   # wi_1 tile
                pl.BlockSpec((tf_p, d_model), lambda i, j: (j, 0)),   # wo^T tile
            ],
            out_specs=pl.BlockSpec((tm_p, d_model), lambda i, j: (i, 0)),
            scratch_shapes=[pltpu.VMEM((tm_p, d_model), jnp.float32)],
        ),
        compiler_params=pltpu.CompilerParams(
            dimension_semantics=("parallel", "arbitrary"),
            vmem_limit_bytes=vmem_limit,
        ),
        cost_estimate=cost,
    )(x2d, wi0c, wi1c, woc)

    if M_pad != M:
        out2d = out2d[:M]
    return out2d.reshape(B, S, d_model)


def _reference(hidden_states, wi0_t, wi1_t, wo_t, compute_dtype=jnp.float32):
    """Pure-JAX reference mirroring the kernel's compute dtype."""
    f32 = jnp.float32
    x = hidden_states.astype(compute_dtype).astype(f32)
    w0 = wi0_t.astype(compute_dtype).astype(f32)
    w1 = wi1_t.astype(compute_dtype).astype(f32)
    wo = wo_t.astype(compute_dtype).astype(f32)
    g = _gelu_new(x @ w0)
    l = x @ w1
    h = (g * l).astype(compute_dtype).astype(f32)
    return (h @ wo).astype(hidden_states.dtype)


# TODO(synk): dropout is implemented as identity (eval mode / p=0); a training
# path would draw a mask with pltpu.prng_seed / pltpu.prng_random_bits.

if __name__ == "__main__":
    # Small T5-like config: batch=2, seq=8, d_model=32, d_ff=128
    B, S, d_model, d_ff = 2, 8, 32, 128

    key = jax.random.PRNGKey(0)
    kx, k0, k1, k2 = jax.random.split(key, 4)

    hidden_states = jax.random.normal(kx, (B, S, d_model), dtype=jnp.float32)
    # torch weights are (out, in); store transposed (in, out) for the kernel.
    wi0_t = 0.02 * jax.random.normal(k0, (d_model, d_ff), dtype=jnp.float32)
    wi1_t = 0.02 * jax.random.normal(k1, (d_model, d_ff), dtype=jnp.float32)
    wo_t = 0.02 * jax.random.normal(k2, (d_ff, d_model), dtype=jnp.float32)

    # Performance path: weights pre-cast ONCE outside jit, bf16 MXU inputs,
    # f32 accumulation.
    wi0_b, wi1_b, wo_b = prepare_weights(wi0_t, wi1_t, wo_t, jnp.bfloat16)
    out = t5_dense_gated_act_dense(hidden_states, wi0_b, wi1_b, wo_b)
    out = jax.block_until_ready(out)
    ref_bf16 = _reference(hidden_states, wi0_t, wi1_t, wo_t,
                          compute_dtype=jnp.bfloat16)
    assert out.shape == (B, S, d_model)
    assert jnp.allclose(out, ref_bf16, rtol=2e-2, atol=5e-5), \
        "mismatch vs bf16 reference"

    # Strict f32 check of the kernel structure (same math as original module).
    out_f32 = t5_dense_gated_act_dense(hidden_states, wi0_t, wi1_t, wo_t,
                                       compute_dtype=jnp.float32)
    out_f32 = jax.block_until_ready(out_f32)
    ref_f32 = _reference(hidden_states, wi0_t, wi1_t, wo_t,
                         compute_dtype=jnp.float32)
    assert jnp.allclose(out_f32, ref_f32, atol=1e-5, rtol=1e-5), \
        "mismatch vs f32 reference"

    print("KERNEL_OK")
</pallas_src>

<mosaic_0001>
module attributes {stable_mosaic.version = 11 : i64} {
  func.func @kernel(%arg0: i32, %arg1: i32, %arg2: memref<16x32xbf16, #tpu.memory_space<vmem>>, %arg3: memref<32x128xbf16, #tpu.memory_space<vmem>>, %arg4: memref<32x128xbf16, #tpu.memory_space<vmem>>, %arg5: memref<128x32xbf16, #tpu.memory_space<vmem>>, %arg6: memref<16x32xf32, #tpu.memory_space<vmem>>, %arg7: memref<16x32xf32, #tpu.memory_space<vmem>>) attributes {dimension_semantics = [#tpu.dimension_semantics<parallel>, #tpu.dimension_semantics<arbitrary>], iteration_bounds = array<i64: 1, 1>, scalar_prefetch = 0 : i64, scratch_operands = 1 : i64, tpu.core_type = #tpu.core_type<tc>, window_params = [{transform_indices = @transform_0, window_bounds = array<i64: 16, 32>}, {transform_indices = @transform_1, window_bounds = array<i64: 32, 128>}, {transform_indices = @transform_2, window_bounds = array<i64: 32, 128>}, {transform_indices = @transform_3, window_bounds = array<i64: 128, 32>}, {transform_indices = @transform_4, window_bounds = array<i64: 16, 32>}]} {
    %c0 = arith.constant 0 : index
    %c0_0 = arith.constant 0 : index
    %0 = vector.load %arg2[%c0, %c0_0] : memref<16x32xbf16, #tpu.memory_space<vmem>>, vector<16x32xbf16>
    %c0_1 = arith.constant 0 : index
    %c0_2 = arith.constant 0 : index
    %1 = vector.load %arg3[%c0_1, %c0_2] : memref<32x128xbf16, #tpu.memory_space<vmem>>, vector<32x128xbf16>
    %cst = arith.constant dense<0.000000e+00> : vector<16x128xf32>
    %2 = tpu.matmul %0, %1, %cst {dimension_numbers = #tpu.dot_dimension_numbers<[1], [0], [0], [1], [0, 0, 1, 1], [], []>} : vector<16x32xbf16>, vector<32x128xbf16>, vector<16x128xf32> -> vector<16x128xf32>
    %c0_3 = arith.constant 0 : index
    %c0_4 = arith.constant 0 : index
    %3 = vector.load %arg4[%c0_3, %c0_4] : memref<32x128xbf16, #tpu.memory_space<vmem>>, vector<32x128xbf16>
    %cst_5 = arith.constant dense<0.000000e+00> : vector<16x128xf32>
    %4 = tpu.matmul %0, %3, %cst_5 {dimension_numbers = #tpu.dot_dimension_numbers<[1], [0], [0], [1], [0, 0, 1, 1], [], []>} : vector<16x32xbf16>, vector<32x128xbf16>, vector<16x128xf32> -> vector<16x128xf32>
    %cst_6 = arith.constant 0.636619746 : f32
    %5 = math.sqrt %cst_6 : f32
    %cst_7 = arith.constant 5.000000e-01 : f32
    %6 = vector.broadcast %cst_7 : f32 to vector<16x128xf32>
    %7 = arith.mulf %6, %2 : vector<16x128xf32>
    %cst_8 = arith.constant 4.471500e-02 : f32
    %8 = vector.broadcast %cst_8 : f32 to vector<16x128xf32>
    %9 = arith.mulf %8, %2 : vector<16x128xf32>
    %10 = arith.mulf %9, %2 : vector<16x128xf32>
    %11 = arith.mulf %10, %2 : vector<16x128xf32>
    %12 = arith.addf %2, %11 : vector<16x128xf32>
    %13 = vector.broadcast %5 : f32 to vector<16x128xf32>
    %14 = arith.mulf %13, %12 : vector<16x128xf32>
    %15 = math.tanh %14 : vector<16x128xf32>
    %cst_9 = arith.constant 1.000000e+00 : f32
    %16 = vector.broadcast %cst_9 : f32 to vector<16x128xf32>
    %17 = arith.addf %16, %15 : vector<16x128xf32>
    %18 = arith.mulf %7, %17 : vector<16x128xf32>
    %19 = arith.mulf %18, %4 : vector<16x128xf32>
    %20 = arith.truncf %19 : vector<16x128xf32> to vector<16x128xbf16>
    %c0_10 = arith.constant 0 : index
    %c0_11 = arith.constant 0 : index
    %21 = vector.load %arg5[%c0_10, %c0_11] : memref<128x32xbf16, #tpu.memory_space<vmem>>, vector<128x32xbf16>
    %cst_12 = arith.constant dense<0.000000e+00> : vector<16x32xf32>
    %22 = tpu.matmul %20, %21, %cst_12 {dimension_numbers = #tpu.dot_dimension_numbers<[1], [0], [0], [1], [0, 0, 1, 1], [], []>} : vector<16x128xbf16>, vector<128x32xbf16>, vector<16x32xf32> -> vector<16x32xf32>
    %c0_i32 = arith.constant 0 : i32
    %23 = arith.cmpi eq, %arg1, %c0_i32 : i32
    %24 = arith.extui %23 : i1 to i32
    %c0_i32_13 = arith.constant 0 : i32
    %25 = arith.cmpi ne, %24, %c0_i32_13 : i32
    scf.if %25 {
      %c0_18 = arith.constant 0 : index
      %c0_19 = arith.constant 0 : index
      %32 = vector.load %arg7[%c0_18, %c0_19] : memref<16x32xf32, #tpu.memory_space<vmem>>, vector<16x32xf32>
      tpu.vector_store %arg7[%c0_18, %c0_19], %22 {strides = array<i32>} : memref<16x32xf32, #tpu.memory_space<vmem>>, vector<16x32xf32>,
    } else {
    }
    %c0_i32_14 = arith.constant 0 : i32
    %26 = arith.cmpi sgt, %arg1, %c0_i32_14 : i32
    %27 = arith.extui %26 : i1 to i32
    %c0_i32_15 = arith.constant 0 : i32
    %28 = arith.cmpi ne, %27, %c0_i32_15 : i32
    scf.if %28 {
      %c0_18 = arith.constant 0 : index
      %c0_19 = arith.constant 0 : index
      %32 = vector.load %arg7[%c0_18, %c0_19] : memref<16x32xf32, #tpu.memory_space<vmem>>, vector<16x32xf32>
      %33 = arith.addf %32, %22 : vector<16x32xf32>
      %c0_20 = arith.constant 0 : index
      %c0_21 = arith.constant 0 : index
      %34 = vector.load %arg7[%c0_20, %c0_21] : memref<16x32xf32, #tpu.memory_space<vmem>>, vector<16x32xf32>
      tpu.vector_store %arg7[%c0_20, %c0_21], %33 {strides = array<i32>} : memref<16x32xf32, #tpu.memory_space<vmem>>, vector<16x32xf32>,
    } else {
    }
    %c0_i32_16 = arith.constant 0 : i32
    %29 = arith.cmpi eq, %arg1, %c0_i32_16 : i32
    %30 = arith.extui %29 : i1 to i32
    %c0_i32_17 = arith.constant 0 : i32
    %31 = arith.cmpi ne, %30, %c0_i32_17 : i32
    scf.if %31 {
      %c0_18 = arith.constant 0 : index
      %c0_19 = arith.constant 0 : index
      %32 = vector.load %arg7[%c0_18, %c0_19] : memref<16x32xf32, #tpu.memory_space<vmem>>, vector<16x32xf32>
      %c0_20 = arith.constant 0 : index
      %c0_21 = arith.constant 0 : index
      %33 = vector.load %arg6[%c0_20, %c0_21] : memref<16x32xf32, #tpu.memory_space<vmem>>, vector<16x32xf32>
      tpu.vector_store %arg6[%c0_20, %c0_21], %32 {strides = array<i32>} : memref<16x32xf32, #tpu.memory_space<vmem>>, vector<16x32xf32>,
    } else {
    }
    return
  }
  func.func @transform_0(%arg0: i32, %arg1: i32) -> (i32, i32) {
    %c0_i32 = arith.constant 0 : i32
    %c0_i32_0 = arith.constant 0 : i32
    return %arg0, %c0_i32 : i32, i32
  }
  func.func @transform_1(%arg0: i32, %arg1: i32) -> (i32, i32) {
    %c0_i32 = arith.constant 0 : i32
    %c0_i32_0 = arith.constant 0 : i32
    return %c0_i32, %arg1 : i32, i32
  }
  func.func @transform_2(%arg0: i32, %arg1: i32) -> (i32, i32) {
    %c0_i32 = arith.constant 0 : i32
    %c0_i32_0 = arith.constant 0 : i32
    return %c0_i32, %arg1 : i32, i32
  }
  func.func @transform_3(%arg0: i32, %arg1: i32) -> (i32, i32) {
    %c0_i32 = arith.constant 0 : i32
    %c0_i32_0 = arith.constant 0 : i32
    return %arg1, %c0_i32 : i32, i32
  }
  func.func @transform_4(%arg0: i32, %arg1: i32) -> (i32, i32) {
    %c0_i32 = arith.constant 0 : i32
    %c0_i32_0 = arith.constant 0 : i32
    return %arg0, %c0_i32 : i32, i32
  }
}

</mosaic_0001>

<bundles_post_ra>
// kernel: t5_dense_gated_act_dense.1
= control target key start
LH: loop header
LB: loop body
LE: loop exit
PB: predicated region body
PF: predicated region fallthrough
CT: control target
= control target key end

     0   :  { %v421_v1 = vmov 0.0   ;;  %vm422_vm0 = vmmov 0   ;;  %vm42_vm1 = vcmask 261120   ;;  %s508_s0 = inlined_call_operand.vmem [shape: bf16[16,32], index: 0, kind: input, shape index: {}]   ;;  %s509_s1 = inlined_call_operand.vmem [shape: bf16[32,128], index: 1, kind: input, shape index: {}]   ;;  %s510_s2 = inlined_call_operand.vmem [shape: bf16[32,128], index: 2, kind: input, shape index: {}]   ;;  %s511_s3 = inlined_call_operand.vmem [shape: bf16[128,32], index: 3, kind: input, shape index: {}]   ;;  %s512_s4 = inlined_call_operand.hbm [shape: f32[16,32], index: 4, kind: output, shape index: {}]  }
   0x1   :  { %v380_v0 = vld [vmem:[%s509_s1] sm:$0xff]   ;;  %339 = vmatprep.subr.bf16.mxu1 %v421_v1  ;;  %355 = vmatprep.subr.bf16.mxu0 %v421_v1  ;;  %v381_v2 = vld [vmem:[%s509_s1 + $0x8] sm:$0xff]  }
   0x2   :  { %340 = vmatpush3.bf16.msra.mxu1 %v380_v0  ;;  %343 = vmatprep.mubr.msk.bf16.mxu1 %vm422_vm0, %v421_v1  ;;  %v382_v3 = vld [vmem:[%s508_s0] sm:$0xff]   ;;  %v384_v5 = vld [vmem:[%s510_s2 + $0x8] sm:$0xff]  }
   0x3   :  { %341 = vmatprep.subr.bf16.mxu1 %v421_v1  ;;  %371 = vmatprep.mubr.msk.bf16.mxu0 %vm422_vm0, %v421_v1  ;;  %v383_v4 = vld [vmem:[%s510_s2] sm:$0xff]  }
   0x6   :  { %342 = vmatpush3.bf16.msra.mxu1 %v381_v2 }
   0x7   :  { %347 = vmatprep.subr.bf16.mxu1 %v421_v1 }
   0x9   :  { %344 = vmatmul.mubr.msk.bf16.vlgmr.msra.gmra.mrb[0].mxu1 %vm42_vm1, %v382_v3 }
   0xa   :  { %348 = vmatpush3.bf16.msra.mxu1 %v383_v4  ;;  %351 = vmatprep.mubr.msk.bf16.mxu1 %vm422_vm0, %v421_v1 }
   0xb   :  { %9 = vsyncpa [#allocation4], 0  ;;  %349 = vmatprep.subr.bf16.mxu1 %v421_v1  ;;  %v385_v6 = vld [vmem:[%s511_s3] sm:$0xff]   ;;  %v386_v7 = vld [vmem:[%s511_s3 + $0x8] sm:$0xff]  }
   0xc   :  { %356 = vmatpush3.bf16.msra.mxu0 %v385_v6  ;;  %v387_v8 = vld [vmem:[%s511_s3 + $0x10] sm:$0xff]   ;;  %v388_v9 = vld [vmem:[%s511_s3 + $0x18] sm:$0xff]   ;;  %v389_v10 = vld [vmem:[%s511_s3 + $0x20] sm:$0xff]  }
   0xd   :  { %357 = vmatprep.subr.bf16.mxu0 %v421_v1  ;;  %v390_v11 = vld [vmem:[%s511_s3 + $0x28] sm:$0xff]   ;;  %v391_v12 = vld [vmem:[%s511_s3 + $0x30] sm:$0xff]   ;;  %v392_v13 = vld [vmem:[%s511_s3 + $0x38] sm:$0xff]   ;;  %s423_s3 = smov [#allocation3]  }
   0xe   :  { %350 = vmatpush3.bf16.msra.mxu1 %v384_v5  ;;  %s298_s12 = sshll.u32 %s423_s3, 4  ;;  %s299_s12 = int_to_ptr.vmem [resolvable:$true] %s298_s12 }
   0xf   :  { %s397_s13 = scalar_lea.vmem %s299_s12, 256  ;;  %p402_p1 = scmp.lt.s32.totalorder %s299_s12, %s299_s12 }
  0x10   :  { %358 = vmatpush3.bf16.msra.mxu0 %v386_v7  ;;  %p398_p0 = scmp.ne.s32.totalorder %s299_s12, %s397_s13  ;;  %p403_p2 = scmp.lt.s32.totalorder %s397_s13, %s397_s13 }
  0x11   :  { %352 = vmatmul.mubr.msk.bf16.vlgmr.msra.gmra.mrb[4].mxu1 %vm42_vm1, %v382_v3  ;;  %359 = vmatprep.subr.bf16.mxu0 %v421_v1 }
  0x12   :  { %p404_p3 = por %p403_p2, %p402_p1 }
  0x14   :  { %360 = vmatpush3.bf16.msra.mxu0 %v387_v8  ;;  %p405_p4 = pnand %p404_p3, %p398_p0 }
  0x15   :  { %361 = vmatprep.subr.bf16.mxu0 %v421_v1 }
  0x18   :  { %362 = vmatpush3.bf16.msra.mxu0 %v388_v9 }
  0x19   :  { %363 = vmatprep.subr.bf16.mxu0 %v421_v1 }
  0x1c   :  { %364 = vmatpush3.bf16.msra.mxu0 %v389_v10 }
  0x1d   :  { %365 = vmatprep.subr.bf16.mxu0 %v421_v1 }
  0x20   :  { %366 = vmatpush3.bf16.msra.mxu0 %v390_v11 }
  0x21   :  { %367 = vmatprep.subr.bf16.mxu0 %v421_v1 }
  0x24   :  { %368 = vmatpush3.bf16.msra.mxu0 %v391_v12 }
  0x25   :  { %369 = vmatprep.subr.bf16.mxu0 %v421_v1 }
  0x28   :  { %370 = vmatpush3.bf16.msra.mxu0 %v392_v13 }
  0xdc   :  { %v80_v14 = vpop.f32.mrb[0].mxu1 }
  0xdd   :  { %v146_v15 = vmul.f32 0.044715, %v80_v14  ;;  %v345_v16 = vpop.f32.mrb[1].mxu1  ;;  %v144_v33 = vmul.f32 0.5, %v80_v14 }
  0xde   :  { %v83_v17 = vpop.f32.mrb[2].mxu1 }
  0xdf   :  { %v148_v18 = vmul.f32 %v146_v15, %v80_v14  ;;  %v147_v19 = vmul.f32 0.044715, %v83_v17  ;;  %v346_v20 = vpop.f32.mrb[3].mxu1  ;;  %v145_v37 = vmul.f32 0.5, %v83_v17 }
  0xe1   :  { %v150_v21 = vmul.f32 %v148_v18, %v80_v14  ;;  %v149_v22 = vmul.f32 %v147_v19, %v83_v17 }
  0xe3   :  { %v151_v23 = vmul.f32 %v149_v22, %v83_v17  ;;  %v152_v24 = vadd.f32 %v150_v21, %v80_v14 }
  0xe4   :  { %v137_v25 = vpop.f32.mrb[4].mxu1 }
  0xe5   :  { %v154_v26 = vmul.f32 0.7978845, %v152_v24  ;;  %v353_v27 = vpop.f32.mrb[5].mxu1  ;;  %v153_v28 = vadd.f32 %v151_v23, %v83_v17 }
  0xe6   :  { %v140_v29 = vpop.f32.mrb[6].mxu1 }
  0xe7   :  { %393 = vtanh.f32 %v154_v26  ;;  %v155_v30 = vmul.f32 0.7978845, %v153_v28  ;;  %v354_v31 = vpop.f32.mrb[7].mxu1 }
  0xe9   :  { %395 = vtanh.f32 %v155_v30 }
  0xf1   :  { %v394_v32 = vpop.eup %393 }
  0xf2   :  { %v158_v34 = vadd.f32 1.0, %v394_v32 }
  0xf3   :  { %v396_v35 = vpop.eup %395 }
  0xf4   :  { %v160_v36 = vmul.f32 %v158_v34, %v144_v33  ;;  %v159_v38 = vadd.f32 1.0, %v396_v35 }
  0xf6   :  { %v162_v39 = vmul.f32 %v160_v36, %v137_v25  ;;  %v161_v40 = vmul.f32 %v159_v38, %v145_v37 }
  0xf8   :  { %v163_v41 = vmul.f32 %v161_v40, %v140_v29 }
  0xfa   :  { %v164_v42 = vpack.c.bf16 %v163_v41, %v162_v39 }
  0xfc   :  { %372 = vmatmul.mubr.bf16.vlgmr.msra.gmra.mrb[0].mxu0 %v164_v42 }
 0x1cf   :  { %v263_v43 = vpop.f32.mrb[0].mxu0 }
 0x1d0   :  { %274 = vst.msk [vmem:[#allocation2] sm:$0xff] %vm42_vm1, %v263_v43  ;;  %v373_v44 = vpop.f32.mrb[1].mxu0 }
 0x1d1   :  { %v266_v45 = vpop.f32.mrb[2].mxu0 }
 0x1d2   :  { %275 = vst.msk [vmem:[#allocation2 + $0x8] sm:$0xff] %vm42_vm1, %v266_v45  ;;  %v374_v46 = vpop.f32.mrb[3].mxu0 }
 0x1d7   :  { %v289_v47 = vld [vmem:[#allocation2] sm:$0xff] }
 0x1d8   :  { %291 = vst.msk [vmem:[#allocation3] sm:$0xff] %vm42_vm1, %v289_v47 }
 0x1d9   :  { %v290_v48 = vld [vmem:[#allocation2 + $0x8] sm:$0xff] }
 0x1da   :  { %292 = vst.msk [vmem:[#allocation3 + $0x8] sm:$0xff] %vm42_vm1, %v290_v48 }
 0x1db   :  { %408 = shalt.err (!%p405_p4)
}
 0x1dc   :  { %s409_s16 = scalar_lea.hbm %s512_s4, 256 }
 0x1dd   :  { %p410_p5 = scmp.ne.s32.totalorder %s512_s4, %s409_s16  ;;  %p413_p6 = scmp.lt.u32.totalorder %s409_s16, %s512_s4 }
 0x1df   :  { %p415_p7 = pnand %p413_p6, %p410_p5 }
 0x1e1   :  { %418 = shalt.err (!%p415_p7)
}
 0x1e2   :  { %s424_s21 = smov 128   ;;  %s425_s22 = smov 8  }
 0x1e3   :  { %304 = dma.vmem_to_hbm [thread:$0]  %s299_s12, 256, %s512_s4, [#allocation4], %s424_s21, %s424_s21, %s425_s22  }
 0x1e4   :  { %419 = dma.done.wait [#allocation4], 256  }
 0x1e5   :  { %420 = vsyncadd [#allocation4], 4294967040 }
 0x1e6   :  { %308 = vsyncpa [#allocation4], 1 }

</bundles_post_ra>
